<compile_context>
chip_gen: v7x
topology: tpu7x:2x2x1
jax: 0.10.0
libtpu: 0.0.40
codegen_flags: <defaults>
</compile_context>

<pallas_src>
import functools

import jax
import jax.numpy as jnp
from jax.experimental import pallas as pl
from jax.experimental.pallas import tpu as pltpu


def conv1x1_pad_tanh_kernel(x_ref, w_ref, b_ref, o_ref, xp_ref, *, padding):
    """tanh(conv1x1(x, w) + b) with `padding` pixels of zero padding.

    x_ref : VMEM (N, Cin, H, W)        input activations (input dtype)
    w_ref : SMEM (Cout*Cin,) float32   flattened 1x1 conv weights
    b_ref : SMEM (Cout,)     float32   bias
    o_ref : VMEM (N, Cout, Hp, Wp)     final padded NCHW output (input dtype)
    xp_ref: VMEM (N, Cin, Hp, Wp) f32  scratch: zero-padded input
    """
    n, cin, h, w = x_ref.shape
    cout = o_ref.shape[1]
    p = padding

    # Zero-pad the input inside VMEM.  Border lanes stay 0, so the uniform
    # formula tanh(sum_k x*w + b) also yields the correct border value
    # tanh(b[c]) with no second pass over the output.
    xp_ref[...] = jnp.zeros_like(xp_ref)
    xp_ref[:, :, p:p + h, p:p + w] = x_ref[...].astype(jnp.float32)
    xp = xp_ref[...]                                    # (N, Cin, Hp, Wp) f32

    # VPU broadcast-FMA accumulation (f32), one slab per output channel.
    chans = []
    for c in range(cout):
        acc = xp[:, 0:1] * w_ref[c * cin + 0]
        for k in range(1, cin):
            acc = acc + xp[:, k:k + 1] * w_ref[c * cin + k]
        chans.append(acc + b_ref[c])
    y = jnp.concatenate(chans, axis=1)                  # (N, Cout, Hp, Wp) f32

    # One EUP tanh over the whole tile, one full-block store, narrow cast last.
    o_ref[...] = jnp.tanh(y).astype(o_ref.dtype)


@functools.partial(jax.jit, static_argnames=("padding",))
def model_tanh_forward(x_nchw, weight, bias, *, padding=2):
    """Equivalent of: tanh(Conv2d(Cin -> Cout, kernel_size=1, padding=p)(x))."""
    N, Cin, H, W = x_nchw.shape
    Cout = weight.shape[0]
    Hp, Wp = H + 2 * padding, W + 2 * padding

    w_flat = weight.reshape(Cout * Cin).astype(jnp.float32)  # 1x1 kernel squeezed
    b_vec = bias.reshape(Cout).astype(jnp.float32)

    kernel = functools.partial(conv1x1_pad_tanh_kernel, padding=padding)
    # Single gridless step: whole problem (~30 KB) resident in VMEM/SMEM; no
    # pipelining overhead.  For large H*W this would instead tile the pixel
    # axis (lane tiles >= 512) with dimension_semantics=("parallel",) so both
    # v7x TensorCores are used and v5e/v7x VMEM limits are respected.
    return pl.pallas_call(
        kernel,
        out_shape=jax.ShapeDtypeStruct((N, Cout, Hp, Wp), x_nchw.dtype),
        in_specs=[
            pl.BlockSpec(memory_space=pltpu.MemorySpace.VMEM),  # x (full block)
            pl.BlockSpec(memory_space=pltpu.MemorySpace.SMEM),  # weights
            pl.BlockSpec(memory_space=pltpu.MemorySpace.SMEM),  # bias
        ],
        out_specs=pl.BlockSpec(memory_space=pltpu.MemorySpace.VMEM),
        scratch_shapes=[pltpu.VMEM((N, Cin, Hp, Wp), jnp.float32)],
    )(x_nchw, w_flat, b_vec)


def reference_forward(x_nchw, weight, bias, *, padding=2):
    # Pure-JAX reference: conv2d (NCHW, OIHW, 1x1 kernel, padding) + bias + tanh.
    y = jax.lax.conv_general_dilated(
        x_nchw.astype(jnp.float32), weight.astype(jnp.float32),
        window_strides=(1, 1),
        padding=((padding, padding), (padding, padding)),
        dimension_numbers=("NCHW", "OIHW", "NCHW"))
    y = y + bias.reshape(1, -1, 1, 1).astype(jnp.float32)
    return jnp.tanh(y).astype(x_nchw.dtype)


if __name__ == "__main__":
    key = jax.random.PRNGKey(0)
    kx, kw, kb = jax.random.split(key, 3)

    # Small shapes consistent with the module: Conv2d(3 -> 4, k=1, padding=2).
    N, Cin, H, W = 2, 3, 16, 16
    Cout, PAD = 4, 2
    x = jax.random.normal(kx, (N, Cin, H, W), dtype=jnp.float32)

    # Deterministic PyTorch-like uniform init bound for a 1x1 kernel.
    bound = 1.0 / (Cin ** 0.5)
    weight = jax.random.uniform(kw, (Cout, Cin, 1, 1), minval=-bound,
                                maxval=bound, dtype=jnp.float32)
    bias = jax.random.uniform(kb, (Cout,), minval=-bound, maxval=bound,
                              dtype=jnp.float32)

    out = model_tanh_forward(x, weight, bias, padding=PAD)
    out = jax.block_until_ready(out)

    ref = reference_forward(x, weight, bias, padding=PAD)
    assert out.shape == (N, Cout, H + 2 * PAD, W + 2 * PAD), out.shape
    assert out.dtype == x.dtype, out.dtype
    assert jnp.allclose(out, ref, atol=1e-5, rtol=1e-5), "mismatch vs reference"

    print("KERNEL_OK")
</pallas_src>

<mosaic_0001>
module attributes {stable_mosaic.version = 11 : i64} {
  func.func @conv1x1_pad_tanh_kernel(%arg0: memref<2x3x16x16xf32, #tpu.memory_space<vmem>>, %arg1: memref<12xf32, #tpu.memory_space<smem>>, %arg2: memref<4xf32, #tpu.memory_space<smem>>, %arg3: memref<2x4x20x20xf32, #tpu.memory_space<vmem>>, %arg4: memref<2x3x20x20xf32, #tpu.memory_space<vmem>>) attributes {dimension_semantics = [], scalar_prefetch = 0 : i64, scratch_operands = 1 : i64, tpu.core_type = #tpu.core_type<tc>} {
    %cst = arith.constant 0.000000e+00 : f32
    %0 = vector.broadcast %cst : f32 to vector<2x3x20x20xf32>
    %c0 = arith.constant 0 : index
    %c0_0 = arith.constant 0 : index
    %c0_1 = arith.constant 0 : index
    %c0_2 = arith.constant 0 : index
    %1 = vector.load %arg4[%c0, %c0_0, %c0_1, %c0_2] : memref<2x3x20x20xf32, #tpu.memory_space<vmem>>, vector<2x3x20x20xf32>
    tpu.vector_store %arg4[%c0, %c0_0, %c0_1, %c0_2], %0 {strides = array<i32>} : memref<2x3x20x20xf32, #tpu.memory_space<vmem>>, vector<2x3x20x20xf32>,
    %c0_3 = arith.constant 0 : index
    %c0_4 = arith.constant 0 : index
    %c0_5 = arith.constant 0 : index
    %c0_6 = arith.constant 0 : index
    %2 = vector.load %arg0[%c0_3, %c0_4, %c0_5, %c0_6] : memref<2x3x16x16xf32, #tpu.memory_space<vmem>>, vector<2x3x16x16xf32>
    %c0_7 = arith.constant 0 : index
    %c0_8 = arith.constant 0 : index
    %c2 = arith.constant 2 : index
    %c2_9 = arith.constant 2 : index
    %3 = vector.load %arg4[%c0_7, %c0_8, %c2, %c2_9] : memref<2x3x20x20xf32, #tpu.memory_space<vmem>>, vector<2x3x16x16xf32>
    tpu.vector_store %arg4[%c0_7, %c0_8, %c2, %c2_9], %2 {strides = array<i32>} : memref<2x3x20x20xf32, #tpu.memory_space<vmem>>, vector<2x3x16x16xf32>,
    %c0_10 = arith.constant 0 : index
    %c0_11 = arith.constant 0 : index
    %c0_12 = arith.constant 0 : index
    %c0_13 = arith.constant 0 : index
    %4 = vector.load %arg4[%c0_10, %c0_11, %c0_12, %c0_13] : memref<2x3x20x20xf32, #tpu.memory_space<vmem>>, vector<2x3x20x20xf32>
    %5 = vector.extract_strided_slice %4 {offsets = [0, 0, 0, 0], sizes = [2, 1, 20, 20], strides = [1, 1, 1, 1]} : vector<2x3x20x20xf32> to vector<2x1x20x20xf32>
    %c0_14 = arith.constant 0 : index
    %6 = memref.load %arg1[%c0_14] : memref<12xf32, #tpu.memory_space<smem>>
    %7 = vector.broadcast %6 : f32 to vector<2x1x20x20xf32>
    %8 = arith.mulf %5, %7 : vector<2x1x20x20xf32>
    %9 = vector.extract_strided_slice %4 {offsets = [0, 1, 0, 0], sizes = [2, 1, 20, 20], strides = [1, 1, 1, 1]} : vector<2x3x20x20xf32> to vector<2x1x20x20xf32>
    %c1 = arith.constant 1 : index
    %10 = memref.load %arg1[%c1] : memref<12xf32, #tpu.memory_space<smem>>
    %11 = vector.broadcast %10 : f32 to vector<2x1x20x20xf32>
    %12 = arith.mulf %9, %11 : vector<2x1x20x20xf32>
    %13 = arith.addf %8, %12 : vector<2x1x20x20xf32>
    %14 = vector.extract_strided_slice %4 {offsets = [0, 2, 0, 0], sizes = [2, 1, 20, 20], strides = [1, 1, 1, 1]} : vector<2x3x20x20xf32> to vector<2x1x20x20xf32>
    %c2_15 = arith.constant 2 : index
    %15 = memref.load %arg1[%c2_15] : memref<12xf32, #tpu.memory_space<smem>>
    %16 = vector.broadcast %15 : f32 to vector<2x1x20x20xf32>
    %17 = arith.mulf %14, %16 : vector<2x1x20x20xf32>
    %18 = arith.addf %13, %17 : vector<2x1x20x20xf32>
    %c0_16 = arith.constant 0 : index
    %19 = memref.load %arg2[%c0_16] : memref<4xf32, #tpu.memory_space<smem>>
    %20 = vector.broadcast %19 : f32 to vector<2x1x20x20xf32>
    %21 = arith.addf %18, %20 : vector<2x1x20x20xf32>
    %22 = vector.extract_strided_slice %4 {offsets = [0, 0, 0, 0], sizes = [2, 1, 20, 20], strides = [1, 1, 1, 1]} : vector<2x3x20x20xf32> to vector<2x1x20x20xf32>
    %c3 = arith.constant 3 : index
    %23 = memref.load %arg1[%c3] : memref<12xf32, #tpu.memory_space<smem>>
    %24 = vector.broadcast %23 : f32 to vector<2x1x20x20xf32>
    %25 = arith.mulf %22, %24 : vector<2x1x20x20xf32>
    %26 = vector.extract_strided_slice %4 {offsets = [0, 1, 0, 0], sizes = [2, 1, 20, 20], strides = [1, 1, 1, 1]} : vector<2x3x20x20xf32> to vector<2x1x20x20xf32>
    %c4 = arith.constant 4 : index
    %27 = memref.load %arg1[%c4] : memref<12xf32, #tpu.memory_space<smem>>
    %28 = vector.broadcast %27 : f32 to vector<2x1x20x20xf32>
    %29 = arith.mulf %26, %28 : vector<2x1x20x20xf32>
    %30 = arith.addf %25, %29 : vector<2x1x20x20xf32>
    %31 = vector.extract_strided_slice %4 {offsets = [0, 2, 0, 0], sizes = [2, 1, 20, 20], strides = [1, 1, 1, 1]} : vector<2x3x20x20xf32> to vector<2x1x20x20xf32>
    %c5 = arith.constant 5 : index
    %32 = memref.load %arg1[%c5] : memref<12xf32, #tpu.memory_space<smem>>
    %33 = vector.broadcast %32 : f32 to vector<2x1x20x20xf32>
    %34 = arith.mulf %31, %33 : vector<2x1x20x20xf32>
    %35 = arith.addf %30, %34 : vector<2x1x20x20xf32>
    %c1_17 = arith.constant 1 : index
    %36 = memref.load %arg2[%c1_17] : memref<4xf32, #tpu.memory_space<smem>>
    %37 = vector.broadcast %36 : f32 to vector<2x1x20x20xf32>
    %38 = arith.addf %35, %37 : vector<2x1x20x20xf32>
    %39 = vector.extract_strided_slice %4 {offsets = [0, 0, 0, 0], sizes = [2, 1, 20, 20], strides = [1, 1, 1, 1]} : vector<2x3x20x20xf32> to vector<2x1x20x20xf32>
    %c6 = arith.constant 6 : index
    %40 = memref.load %arg1[%c6] : memref<12xf32, #tpu.memory_space<smem>>
    %41 = vector.broadcast %40 : f32 to vector<2x1x20x20xf32>
    %42 = arith.mulf %39, %41 : vector<2x1x20x20xf32>
    %43 = vector.extract_strided_slice %4 {offsets = [0, 1, 0, 0], sizes = [2, 1, 20, 20], strides = [1, 1, 1, 1]} : vector<2x3x20x20xf32> to vector<2x1x20x20xf32>
    %c7 = arith.constant 7 : index
    %44 = memref.load %arg1[%c7] : memref<12xf32, #tpu.memory_space<smem>>
    %45 = vector.broadcast %44 : f32 to vector<2x1x20x20xf32>
    %46 = arith.mulf %43, %45 : vector<2x1x20x20xf32>
    %47 = arith.addf %42, %46 : vector<2x1x20x20xf32>
    %48 = vector.extract_strided_slice %4 {offsets = [0, 2, 0, 0], sizes = [2, 1, 20, 20], strides = [1, 1, 1, 1]} : vector<2x3x20x20xf32> to vector<2x1x20x20xf32>
    %c8 = arith.constant 8 : index
    %49 = memref.load %arg1[%c8] : memref<12xf32, #tpu.memory_space<smem>>
    %50 = vector.broadcast %49 : f32 to vector<2x1x20x20xf32>
    %51 = arith.mulf %48, %50 : vector<2x1x20x20xf32>
    %52 = arith.addf %47, %51 : vector<2x1x20x20xf32>
    %c2_18 = arith.constant 2 : index
    %53 = memref.load %arg2[%c2_18] : memref<4xf32, #tpu.memory_space<smem>>
    %54 = vector.broadcast %53 : f32 to vector<2x1x20x20xf32>
    %55 = arith.addf %52, %54 : vector<2x1x20x20xf32>
    %56 = vector.extract_strided_slice %4 {offsets = [0, 0, 0, 0], sizes = [2, 1, 20, 20], strides = [1, 1, 1, 1]} : vector<2x3x20x20xf32> to vector<2x1x20x20xf32>
    %c9 = arith.constant 9 : index
    %57 = memref.load %arg1[%c9] : memref<12xf32, #tpu.memory_space<smem>>
    %58 = vector.broadcast %57 : f32 to vector<2x1x20x20xf32>
    %59 = arith.mulf %56, %58 : vector<2x1x20x20xf32>
    %60 = vector.extract_strided_slice %4 {offsets = [0, 1, 0, 0], sizes = [2, 1, 20, 20], strides = [1, 1, 1, 1]} : vector<2x3x20x20xf32> to vector<2x1x20x20xf32>
    %c10 = arith.constant 10 : index
    %61 = memref.load %arg1[%c10] : memref<12xf32, #tpu.memory_space<smem>>
    %62 = vector.broadcast %61 : f32 to vector<2x1x20x20xf32>
    %63 = arith.mulf %60, %62 : vector<2x1x20x20xf32>
    %64 = arith.addf %59, %63 : vector<2x1x20x20xf32>
    %65 = vector.extract_strided_slice %4 {offsets = [0, 2, 0, 0], sizes = [2, 1, 20, 20], strides = [1, 1, 1, 1]} : vector<2x3x20x20xf32> to vector<2x1x20x20xf32>
    %c11 = arith.constant 11 : index
    %66 = memref.load %arg1[%c11] : memref<12xf32, #tpu.memory_space<smem>>
    %67 = vector.broadcast %66 : f32 to vector<2x1x20x20xf32>
    %68 = arith.mulf %65, %67 : vector<2x1x20x20xf32>
    %69 = arith.addf %64, %68 : vector<2x1x20x20xf32>
    %c3_19 = arith.constant 3 : index
    %70 = memref.load %arg2[%c3_19] : memref<4xf32, #tpu.memory_space<smem>>
    %71 = vector.broadcast %70 : f32 to vector<2x1x20x20xf32>
    %72 = arith.addf %69, %71 : vector<2x1x20x20xf32>
    %73 = tpu.concatenate %21, %38, %55, %72 in 1 : vector<2x1x20x20xf32>, vector<2x1x20x20xf32>, vector<2x1x20x20xf32>, vector<2x1x20x20xf32> -> vector<2x4x20x20xf32>
    %74 = math.tanh %73 : vector<2x4x20x20xf32>
    %c0_20 = arith.constant 0 : index
    %c0_21 = arith.constant 0 : index
    %c0_22 = arith.constant 0 : index
    %c0_23 = arith.constant 0 : index
    %75 = vector.load %arg3[%c0_20, %c0_21, %c0_22, %c0_23] : memref<2x4x20x20xf32, #tpu.memory_space<vmem>>, vector<2x4x20x20xf32>
    tpu.vector_store %arg3[%c0_20, %c0_21, %c0_22, %c0_23], %74 {strides = array<i32>} : memref<2x4x20x20xf32, #tpu.memory_space<vmem>>, vector<2x4x20x20xf32>,
    return
  }
}

</mosaic_0001>

<bundles_post_ra>
// kernel: model_tanh_forward.1
= control target key start
LH: loop header
LB: loop body
LE: loop exit
PB: predicated region body
PF: predicated region fallthrough
CT: control target
= control target key end

     0   :  { %8 = vsyncpa [#allocation4], 0  ;;  %s902_s0 = inlined_call_operand.hbm [shape: f32[2,3,16,16], index: 0, kind: input, shape index: {}]   ;;  %s903_s1 = inlined_call_operand.vmem [shape: f32[12], index: 1, kind: input, shape index: {}]   ;;  %s904_s2 = inlined_call_operand.vmem [shape: f32[4], index: 2, kind: input, shape index: {}]   ;;  %s905_s3 = inlined_call_operand.vmem [shape: f32[2,4,20,20], index: 3, kind: output, shape index: {}]  }
   0x1   :  { %9 = vsyncpa [#allocation5], 0 }
   0x2   :  { %10 = vsyncpa [#allocation8], 0  ;;  %s516_s12 = smov [#allocation3]   ;;  %s29_s16 = sshll.u32 %s903_s1, 4  ;;  %s30_s16 = int_to_ptr.vmem [resolvable:$true] %s29_s16 }
   0x3   :  { %s16_s13 = sshll.u32 %s516_s12, 4  ;;  %s464_s19 = scalar_lea.hbm %s902_s0, 1536  ;;  %s17_s13 = int_to_ptr.vmem [resolvable:$true] %s16_s13 }
   0x4   :  { %p465_p0 = scmp.ne.s32.totalorder %s902_s0, %s464_s19  ;;  %p468_p1 = scmp.lt.u32.totalorder %s464_s19, %s902_s0 }
   0x6   :  { %p470_p2 = pnand %p468_p1, %p465_p0 }
   0x8   :  { %473 = shalt.err (!%p470_p2)
}
   0x9   :  { %s474_s24 = scalar_lea.vmem %s17_s13, 1536  ;;  %p479_p4 = scmp.lt.s32.totalorder %s17_s13, %s17_s13 }
   0xa   :  { %p475_p3 = scmp.ne.s32.totalorder %s17_s13, %s474_s24  ;;  %p480_p5 = scmp.lt.s32.totalorder %s474_s24, %s474_s24 }
   0xc   :  { %p481_p6 = por %p480_p5, %p479_p4 }
   0xe   :  { %p482_p7 = pnand %p481_p6, %p475_p3 }
  0x10   :  { %485 = shalt.err (!%p482_p7)
}
  0x11   :  { %s517_s1 = smov 128   ;;  %s518_s25 = smov 8  }
  0x12   :  { %22 = dma.hbm_to_vmem [thread:$0]  %s902_s0, 1536, %s17_s13, [#allocation4], %s517_s1, %s517_s1, %s518_s25  }
  0x13   :  { %s486_s28 = scalar_lea.vmem %s30_s16, 16  ;;  %p491_p9 = scmp.lt.s32.totalorder %s30_s16, %s30_s16 }
  0x14   :  { %p487_p8 = scmp.ne.s32.totalorder %s30_s16, %s486_s28  ;;  %p492_p10 = scmp.lt.s32.totalorder %s486_s28, %s486_s28 }
  0x16   :  { %p493_p11 = por %p492_p10, %p491_p9 }
  0x18   :  { %p494_p12 = pnand %p493_p11, %p487_p8 }
  0x1a   :  { %497 = shalt.err (!%p494_p12)
}
  0x1b   :  { %s519_s29 = smov [#allocation6]   ;;  %s39_s5 = sshll.u32 %s904_s2, 4  ;;  %s40_s5 = int_to_ptr.vmem [resolvable:$true] %s39_s5 }
  0x1c   :  { %32 = dma.vmem_to_smem %s30_s16, 16, %s519_s29, [#allocation5]  }
  0x1d   :  { %s498_s6 = scalar_lea.vmem %s40_s5, 16  ;;  %p503_p0 = scmp.lt.s32.totalorder %s40_s5, %s40_s5 }
  0x1e   :  { %p499_p13 = scmp.ne.s32.totalorder %s40_s5, %s498_s6  ;;  %p504_p1 = scmp.lt.s32.totalorder %s498_s6, %s498_s6 }
  0x20   :  { %p505_p2 = por %p504_p1, %p503_p0 }
  0x22   :  { %p506_p3 = pnand %p505_p2, %p499_p13 }
  0x24   :  { %509 = shalt.err (!%p506_p3)
}
  0x25   :  { %s520_s0 = smov [#allocation7]  }
  0x26   :  { %42 = dma.vmem_to_smem %s40_s5, 16, %s520_s0, [#allocation8]  }
  0x27   :  { %510 = dma.done.wait [#allocation4], 1536  }
  0x28   :  { %511 = vsyncadd [#allocation4], 4294965760 }
  0x29   :  { %512 = dma.done.wait [#allocation5], 16  }
  0x2a   :  { %513 = vsyncadd [#allocation5], 4294967280 }
  0x2b   :  { %514 = dma.done.wait [#allocation8], 16  }
  0x2c   :  { %515 = vsyncadd [#allocation8], 4294967280 }
  0x2d   :  { %52 = sfence }
  0x2e   :  { %v75_v0 = vld [vmem:[#allocation3 + $0x10] sm:$0xff]  ;;  %v73_v1 = vld [vmem:[#allocation3] sm:$0xff]  ;;  %vm53_vm0 = vcmask 162816   ;;  %s521_s2 = smov 2   ;;  %v76_v2 = vld [vmem:[#allocation3 + $0x18] sm:$0xff]  ;;  %v522_v4 = vmov 0.0  }
  0x2f   :  { %101 = vrot.lane.b32.xlu1 %v75_v0, %s521_s2  ;;  %97 = vrot.lane.b32.xlu0 %v73_v1, %s521_s2  ;;  %v74_v3 = vld [vmem:[#allocation3 + $0x8] sm:$0xff]  ;;  %58 = vst.msk [vmem:[#allocation2 + $0x18] sm:$0xff] %vm53_vm0, %v522_v4  ;;  %59 = vst.msk [vmem:[#allocation2 + $0x20] sm:$0xff] %vm53_vm0, %v522_v4  ;;  %vm56_vm1 = vcmask 158720   ;;  %v80_v5 = vld [vmem:[#allocation3 + $0x38] sm:$0xff]  ;;  %s395_s7 = sld [smem:[#allocation6 + $0x1]] }
  0x30   :  { %54 = vst.msk [vmem:[#allocation2] sm:$0xff] %vm53_vm0, %v522_v4  ;;  %55 = vst.msk [vmem:[#allocation2 + $0x8] sm:$0xff] %vm53_vm0, %v522_v4  ;;  %v79_v6 = vld [vmem:[#allocation3 + $0x30] sm:$0xff]  ;;  %v82_v7 = vld [vmem:[#allocation3 + $0x48] sm:$0xff]  ;;  %s398_s8 = sld [smem:[#allocation6 + $0x4]]  ;;  %s402_s9 = sld [smem:[#allocation6 + $0x7]] }
  0x31   :  { %61 = vst.msk [vmem:[#allocation2 + $0x30] sm:$0xff] %vm53_vm0, %v522_v4  ;;  %62 = vst.msk [vmem:[#allocation2 + $0x38] sm:$0xff] %vm53_vm0, %v522_v4  ;;  %v81_v8 = vld [vmem:[#allocation3 + $0x40] sm:$0xff]  ;;  %v78_v9 = vld [vmem:[#allocation3 + $0x28] sm:$0xff]  ;;  %s406_s10 = sld [smem:[#allocation6 + $0xa]]  ;;  %s164_s11 = sld [smem:[#allocation6]] }
  0x32   :  { %64 = vst.msk [vmem:[#allocation2 + $0x48] sm:$0xff] %vm53_vm0, %v522_v4  ;;  %65 = vst.msk [vmem:[#allocation2 + $0x50] sm:$0xff] %vm53_vm0, %v522_v4  ;;  %v77_v10 = vld [vmem:[#allocation3 + $0x20] sm:$0xff]  ;;  %v84_v11 = vld [vmem:[#allocation3 + $0x58] sm:$0xff]  ;;  %vm133_vm2 = vcmask 146448   ;;  %s397_s12 = sld [smem:[#allocation6 + $0x3]] }
  0x33   :  { %67 = vst.msk [vmem:[#allocation2 + $0x60] sm:$0xff] %vm53_vm0, %v522_v4  ;;  %68 = vst.msk [vmem:[#allocation2 + $0x68] sm:$0xff] %vm53_vm0, %v522_v4  ;;  %103 = vrot.lane.b32.xlu1 %v76_v2, %s521_s2  ;;  %99 = vrot.lane.b32.xlu0 %v74_v3, %s521_s2  ;;  %v83_v12 = vld [vmem:[#allocation3 + $0x50] sm:$0xff]  ;;  %s401_s13 = sld [smem:[#allocation6 + $0x6]]  ;;  %s405_s14 = sld [smem:[#allocation6 + $0x9]] }
  0x34   :  { %70 = vst.msk [vmem:[#allocation2 + $0x78] sm:$0xff] %vm53_vm0, %v522_v4  ;;  %71 = vst.msk [vmem:[#allocation2 + $0x80] sm:$0xff] %vm53_vm0, %v522_v4  ;;  %s396_s15 = sld [smem:[#allocation6 + $0x2]]  ;;  %s399_s16 = sld [smem:[#allocation6 + $0x5]] }
  0x35   :  { %60 = vst.msk [vmem:[#allocation2 + $0x28] sm:$0xf] %vm56_vm1, %v522_v4  ;;  %57 = vst.msk [vmem:[#allocation2 + $0x10] sm:$0xf] %vm56_vm1, %v522_v4  ;;  %s403_s17 = sld [smem:[#allocation6 + $0x8]]  ;;  %s407_s18 = sld [smem:[#allocation6 + $0xb]]  ;;  %v603_v17 = vstv %s395_s7 }
  0x36   :  { %63 = vst.msk [vmem:[#allocation2 + $0x40] sm:$0xf] %vm56_vm1, %v522_v4  ;;  %66 = vst.msk [vmem:[#allocation2 + $0x58] sm:$0xf] %vm56_vm1, %v522_v4  ;;  %s593_s19 = sld [smem:[#allocation7]]  ;;  %s595_s20 = sld [smem:[#allocation7 + $0x1]]  ;;  %v605_v18 = vstv %s398_s8  ;;  %v607_v19 = vstv %s402_s9 }
  0x37   :  { %69 = vst.msk [vmem:[#allocation2 + $0x70] sm:$0xf] %vm56_vm1, %v522_v4  ;;  %72 = vst.msk [vmem:[#allocation2 + $0x88] sm:$0xf] %vm56_vm1, %v522_v4  ;;  %111 = vrot.lane.b32.xlu1 %v80_v5, %s521_s2  ;;  %109 = vrot.lane.b32.xlu0 %v79_v6, %s521_s2  ;;  %s597_s21 = sld [smem:[#allocation7 + $0x2]]  ;;  %s599_s22 = sld [smem:[#allocation7 + $0x3]]  ;;  %v609_v20 = vstv %s406_s10  ;;  %v611_v21 = vstv %s164_s11 }
  0x38   :  { %v613_v22 = vstv %s397_s12 }
  0x39   :  { %v615_v23 = vstv %s401_s13  ;;  %v617_v25 = vstv %s405_s14 }
  0x3a   :  { %v619_v29 = vstv %s396_s15  ;;  %v621_v30 = vstv %s399_s16 }
  0x3b   :  { %115 = vrot.lane.b32.xlu1 %v82_v7, %s521_s2  ;;  %113 = vrot.lane.b32.xlu0 %v81_v8, %s521_s2  ;;  %v623_v31 = vstv %s403_s17  ;;  %v630_v35 = vstv %s407_s18 }
  0x3c   :  { %v636_v39 = vstv %s593_s19  ;;  %v640_v41 = vstv %s595_s20 }
  0x3d   :  { %v643_v42 = vstv %s597_s21  ;;  %v646_v43 = vstv %s599_s22 }
  0x3f   :  { %107 = vrot.lane.b32.xlu1 %v78_v9, %s521_s2  ;;  %105 = vrot.lane.b32.xlu0 %v77_v10, %s521_s2 }
  0x43   :  { %119 = vrot.lane.b32.xlu1 %v84_v11, %s521_s2  ;;  %117 = vrot.lane.b32.xlu0 %v83_v12, %s521_s2 }
  0xa1   :  { %v102_v13 = vpop.permute.xlu1 %101  ;;  %v98_v14 = vpop.permute.xlu0 %97 }
  0xa2   :  { %136 = vst.msk [vmem:[#allocation2 + $0x1a] sm:$0xff] %vm133_vm2, %v102_v13  ;;  %134 = vst.msk [vmem:[#allocation2 + $0x2] sm:$0xff] %vm133_vm2, %v98_v14 }
  0xa5   :  { %v104_v15 = vpop.permute.xlu1 %103  ;;  %v100_v16 = vpop.permute.xlu0 %99 }
  0xa6   :  { %137 = vst.msk [vmem:[#allocation2 + $0x22] sm:$0xff] %vm133_vm2, %v104_v15  ;;  %135 = vst.msk [vmem:[#allocation2 + $0xa] sm:$0xff] %vm133_vm2, %v100_v16 }
  0xa9   :  { %v149_v24 = vld [vmem:[#allocation2 + $0x18] sm:$0xff]  ;;  %v146_v26 = vld [vmem:[#allocation2] sm:$0xff]  ;;  %v112_v27 = vpop.permute.xlu1 %111  ;;  %v110_v28 = vpop.permute.xlu0 %109 }
  0xaa   :  { %v174_v32 = vmul.f32 %v603_v17, %v149_v24  ;;  %v218_v33 = vmul.f32 %v605_v18, %v149_v24  ;;  %v262_v34 = vmul.f32 %v607_v19, %v149_v24  ;;  %141 = vst.msk [vmem:[#allocation2 + $0x52] sm:$0xff] %vm133_vm2, %v112_v27  ;;  %140 = vst.msk [vmem:[#allocation2 + $0x4a] sm:$0xff] %vm133_vm2, %v110_v28 }
  0xab   :  { %v166_v36 = vmul.f32 %v611_v21, %v146_v26  ;;  %v210_v37 = vmul.f32 %v613_v22, %v146_v26  ;;  %v254_v38 = vmul.f32 %v615_v23, %v146_v26  ;;  %v306_v40 = vmul.f32 %v609_v20, %v149_v24 }
  0xac   :  { %v298_v47 = vmul.f32 %v617_v25, %v146_v26 }
  0xad   :  { %v648_v44 = vadd.f32 %v174_v32, %v166_v36  ;;  %v650_v45 = vadd.f32 %v218_v33, %v210_v37  ;;  %v652_v46 = vadd.f32 %v262_v34, %v254_v38  ;;  %v150_v48 = vld [vmem:[#allocation2 + $0x20] sm:$0xff]  ;;  %v151_v49 = vld [vmem:[#allocation2 + $0x28] sm:$0xf]  ;;  %v116_v51 = vpop.permute.xlu1 %115  ;;  %v114_v52 = vpop.permute.xlu0 %113  ;;  %v148_v57 = vld [vmem:[#allocation2 + $0x10] sm:$0xf] }
  0xae   :  { %v147_v50 = vld [vmem:[#allocation2 + $0x8] sm:$0xff]  ;;  %v175_v53 = vmul.f32 %v603_v17, %v150_v48  ;;  %v176_v54 = vmul.f32 %v603_v17, %v151_v49  ;;  %v219_v55 = vmul.f32 %v605_v18, %v150_v48  ;;  %v220_v56 = vmul.f32 %v605_v18, %v151_v49  ;;  %143 = vst.msk [vmem:[#allocation2 + $0x6a] sm:$0xff] %vm133_vm2, %v116_v51 }
  0xaf   :  { %142 = vst.msk [vmem:[#allocation2 + $0x62] sm:$0xff] %vm133_vm2, %v114_v52  ;;  %v263_v58 = vmul.f32 %v607_v19, %v150_v48  ;;  %v264_v59 = vmul.f32 %v607_v19, %v151_v49  ;;  %v307_v60 = vmul.f32 %v609_v20, %v150_v48  ;;  %v308_v61 = vmul.f32 %v609_v20, %v151_v49 }
  0xb0   :  { %v167_v62 = vmul.f32 %v611_v21, %v147_v50  ;;  %v168_v63 = vmul.f32 %v611_v21, %v148_v57  ;;  %v211_v0 = vmul.f32 %v613_v22, %v147_v50  ;;  %v212_v1 = vmul.f32 %v613_v22, %v148_v57 }
  0xb1   :  { %v255_v2 = vmul.f32 %v615_v23, %v147_v50  ;;  %v256_v3 = vmul.f32 %v615_v23, %v148_v57  ;;  %v299_v4 = vmul.f32 %v617_v25, %v147_v50  ;;  %v300_v5 = vmul.f32 %v617_v25, %v148_v57  ;;  %v157_v6 = vld [vmem:[#allocation2 + $0x58] sm:$0xf]  ;;  %v108_v7 = vpop.permute.xlu1 %107  ;;  %v106_v8 = vpop.permute.xlu0 %105  ;;  %v155_v13 = vld [vmem:[#allocation2 + $0x48] sm:$0xff]  ;;  %v156_v14 = vld [vmem:[#allocation2 + $0x50] sm:$0xff] }
  0xb2   :  { %v673_v9 = vadd.f32 %v306_v40, %v298_v47  ;;  %v675_v10 = vadd.f32 %v175_v53, %v167_v62  ;;  %v182_v11 = vadd.f32 %v176_v54, %v168_v63  ;;  %v677_v12 = vadd.f32 %v219_v55, %v211_v0  ;;  %139 = vst.msk [vmem:[#allocation2 + $0x3a] sm:$0xff] %vm133_vm2, %v108_v7 }
  0xb3   :  { %138 = vst.msk [vmem:[#allocation2 + $0x32] sm:$0xff] %vm133_vm2, %v106_v8  ;;  %v226_v15 = vadd.f32 %v220_v56, %v212_v1  ;;  %v681_v16 = vadd.f32 %v263_v58, %v255_v2  ;;  %v270_v24 = vadd.f32 %v264_v59, %v256_v3  ;;  %v683_v26 = vadd.f32 %v307_v60, %v299_v4 }
  0xb4   :  { %v314_v27 = vadd.f32 %v308_v61, %v300_v5  ;;  %v171_v28 = vmul.f32 %v611_v21, %v157_v6  ;;  %v215_v32 = vmul.f32 %v613_v22, %v157_v6  ;;  %v259_v33 = vmul.f32 %v615_v23, %v157_v6 }
  0xb5   :  { %v303_v34 = vmul.f32 %v617_v25, %v157_v6  ;;  %v169_v36 = vmul.f32 %v611_v21, %v155_v13  ;;  %v170_v37 = vmul.f32 %v611_v21, %v156_v14  ;;  %v213_v38 = vmul.f32 %v613_v22, %v155_v13  ;;  %v160_v40 = vld [vmem:[#allocation2 + $0x70] sm:$0xf]  ;;  %v120_v49 = vpop.permute.xlu1 %119  ;;  %v118_v50 = vpop.permute.xlu0 %117 }
  0xb6   :  { %v158_v47 = vld [vmem:[#allocation2 + $0x60] sm:$0xff]  ;;  %v159_v48 = vld [vmem:[#allocation2 + $0x68] sm:$0xff]  ;;  %v214_v51 = vmul.f32 %v613_v22, %v156_v14  ;;  %v257_v52 = vmul.f32 %v615_v23, %v155_v13  ;;  %v258_v53 = vmul.f32 %v615_v23, %v156_v14  ;;  %v301_v54 = vmul.f32 %v617_v25, %v155_v13  ;;  %145 = vst.msk [vmem:[#allocation2 + $0x82] sm:$0xff] %vm133_vm2, %v120_v49 }
  0xb7   :  { %144 = vst.msk [vmem:[#allocation2 + $0x7a] sm:$0xff] %vm133_vm2, %v118_v50  ;;  %v179_v21 = vmul.f32 %v603_v17, %v160_v40  ;;  %v223_v55 = vmul.f32 %v605_v18, %v160_v40  ;;  %v267_v56 = vmul.f32 %v607_v19, %v160_v40  ;;  %v311_v57 = vmul.f32 %v609_v20, %v160_v40 }
  0xb8   :  { %v177_v22 = vmul.f32 %v603_v17, %v158_v47  ;;  %v178_v58 = vmul.f32 %v603_v17, %v159_v48  ;;  %v221_v23 = vmul.f32 %v605_v18, %v158_v47  ;;  %v222_v59 = vmul.f32 %v605_v18, %v159_v48 }
  0xb9   :  { %v707_v60 = vmul.f32 %v617_v25, %v156_v14  ;;  %v709_v61 = vadd.f32 %v179_v21, %v171_v28  ;;  %v711_v62 = vadd.f32 %v223_v55, %v215_v32  ;;  %v713_v63 = vadd.f32 %v267_v56, %v259_v33  ;;  %v154_v0 = vld [vmem:[#allocation2 + $0x40] sm:$0xf] }
  0xba   :  { %v715_v1 = vadd.f32 %v311_v57, %v303_v34  ;;  %v717_v2 = vadd.f32 %v177_v22, %v169_v36  ;;  %v719_v3 = vadd.f32 %v178_v58, %v170_v37  ;;  %v721_v17 = vadd.f32 %v221_v23, %v213_v38  ;;  %v152_v14 = vld [vmem:[#allocation2 + $0x30] sm:$0xff]  ;;  %v153_v28 = vld [vmem:[#allocation2 + $0x38] sm:$0xff] }
  0xbb   :  { %v723_v4 = vadd.f32 %v222_v59, %v214_v51  ;;  %v265_v18 = vmul.f32 %v607_v19, %v158_v47  ;;  %v266_v25 = vmul.f32 %v607_v19, %v159_v48  ;;  %v309_v5 = vmul.f32 %v609_v20, %v158_v47 }
  0xbc   :  { %v190_v6 = vmul.f32 %v619_v29, %v154_v0  ;;  %v234_v7 = vmul.f32 %v621_v30, %v154_v0  ;;  %v278_v8 = vmul.f32 %v623_v31, %v154_v0  ;;  %v322_v13 = vmul.f32 %v630_v35, %v154_v0 }
  0xbd   :  { %v732_v32 = vadd.f32 %v265_v18, %v257_v52  ;;  %v734_v33 = vadd.f32 %v266_v25, %v258_v53  ;;  %v737_v34 = vmul.f32 %v609_v20, %v159_v48  ;;  %v739_v19 = vadd.f32 %v309_v5, %v301_v54  ;;  %v163_v56 = vld [vmem:[#allocation2 + $0x88] sm:$0xf] }
  0xbe   :  { %v196_v36 = vadd.f32 %v190_v6, %v182_v11  ;;  %v240_v37 = vadd.f32 %v234_v7, %v226_v15  ;;  %v284_v38 = vadd.f32 %v278_v8, %v270_v24  ;;  %v328_v40 = vadd.f32 %v322_v13, %v314_v27  ;;  %v161_v5 = vld [vmem:[#allocation2 + $0x78] sm:$0xff]  ;;  %v162_v13 = vld [vmem:[#allocation2 + $0x80] sm:$0xff] }
  0xbf   :  { %v188_v47 = vmul.f32 %v619_v29, %v152_v14  ;;  %v189_v49 = vmul.f32 %v619_v29, %v153_v28  ;;  %v232_v50 = vmul.f32 %v621_v30, %v152_v14  ;;  %v233_v51 = vmul.f32 %v621_v30, %v153_v28 }
  0xc0   :  { %v204_v52 = vadd.f32 %v636_v39, %v196_v36  ;;  %v248_v53 = vadd.f32 %v640_v41, %v240_v37  ;;  %v292_v20 = vadd.f32 %v643_v42, %v284_v38  ;;  %v336_v48 = vadd.f32 %v646_v43, %v328_v40 }
  0xc1   :  { %v194_v11 = vadd.f32 %v188_v47, %v648_v44  ;;  %v195_v15 = vadd.f32 %v189_v49, %v675_v10  ;;  %v238_v24 = vadd.f32 %v232_v50, %v650_v45  ;;  %v239_v27 = vadd.f32 %v233_v51, %v677_v12 }
  0xc2   :  { %416 = vtanh.f32 %v204_v52  ;;  %v276_v54 = vmul.f32 %v623_v31, %v152_v14  ;;  %v277_v21 = vmul.f32 %v623_v31, %v153_v28  ;;  %v320_v55 = vmul.f32 %v630_v35, %v152_v14 }
  0xc3   :  { %418 = vtanh.f32 %v248_v53  ;;  %v202_v57 = vadd.f32 %v636_v39, %v194_v11  ;;  %v203_v22 = vadd.f32 %v636_v39, %v195_v15  ;;  %v246_v44 = vadd.f32 %v640_v41, %v238_v24 }
  0xc4   :  { %420 = vtanh.f32 %v292_v20  ;;  %v247_v45 = vadd.f32 %v640_v41, %v239_v27  ;;  %v282_v10 = vadd.f32 %v276_v54, %v652_v46  ;;  %v283_v12 = vadd.f32 %v277_v21, %v681_v16 }
  0xc5   :  { %422 = vtanh.f32 %v336_v48  ;;  %v321_v58 = vmul.f32 %v630_v35, %v153_v28  ;;  %v326_v23 = vadd.f32 %v320_v55, %v673_v9  ;;  %v193_v59 = vmul.f32 %v619_v29, %v163_v56 }
  0xc6   :  { %v290_v0 = vadd.f32 %v643_v42, %v282_v10  ;;  %v291_v18 = vadd.f32 %v643_v42, %v283_v12  ;;  %424 = vtanh.f32 %v202_v57  ;;  %v237_v25 = vmul.f32 %v621_v30, %v163_v56 }
  0xc7   :  { %v327_v6 = vadd.f32 %v321_v58, %v683_v26  ;;  %v334_v46 = vadd.f32 %v646_v43, %v326_v23  ;;  %426 = vtanh.f32 %v203_v22  ;;  %v199_v16 = vadd.f32 %v193_v59, %v709_v61 }
  0xc8   :  { %428 = vtanh.f32 %v246_v44  ;;  %v243_v9 = vadd.f32 %v237_v25, %v711_v62  ;;  %v281_v7 = vmul.f32 %v623_v31, %v163_v56  ;;  %v325_v8 = vmul.f32 %v630_v35, %v163_v56 }
  0xc9   :  { %v335_v14 = vadd.f32 %v646_v43, %v327_v6  ;;  %430 = vtanh.f32 %v247_v45  ;;  %v207_v28 = vadd.f32 %v636_v39, %v199_v16  ;;  %v191_v26 = vmul.f32 %v619_v29, %v161_v5 }
  0xca   :  { %432 = vtanh.f32 %v290_v0  ;;  %v251_v36 = vadd.f32 %v640_v41, %v243_v9  ;;  %v287_v61 = vadd.f32 %v281_v7, %v713_v63  ;;  %v331_v37 = vadd.f32 %v325_v8, %v715_v1 }
  0xcb   :  { %434 = vtanh.f32 %v291_v18  ;;  %v192_v62 = vmul.f32 %v619_v29, %v162_v13  ;;  %v197_v38 = vadd.f32 %v191_v26, %v717_v2  ;;  %v235_v40 = vmul.f32 %v621_v30, %v161_v5 }
  0xcc   :  { %v417_v47 = vpop.eup %416  ;;  %436 = vtanh.f32 %v334_v46  ;;  %v295_v49 = vadd.f32 %v643_v42, %v287_v61  ;;  %v339_v50 = vadd.f32 %v646_v43, %v331_v37  ;;  %v236_v51 = vmul.f32 %v621_v30, %v162_v13 }
  0xcd   :  { %v419_v52 = vpop.eup %418  ;;  %366 = vst.msk [vmem:[%s905_s3 + $0x10] sm:$0xf] %vm56_vm1, %v417_v47  ;;  %438 = vtanh.f32 %v335_v14  ;;  %v198_v29 = vadd.f32 %v192_v62, %v719_v3  ;;  %v205_v63 = vadd.f32 %v636_v39, %v197_v38  ;;  %v241_v1 = vadd.f32 %v235_v40, %v721_v17 }
  0xce   :  { %v421_v2 = vpop.eup %420  ;;  %369 = vst.msk [vmem:[%s905_s3 + $0x28] sm:$0xf] %vm56_vm1, %v419_v52  ;;  %440 = vtanh.f32 %v207_v28  ;;  %v242_v30 = vadd.f32 %v236_v51, %v723_v4  ;;  %v279_v53 = vmul.f32 %v623_v31, %v161_v5  ;;  %v280_v20 = vmul.f32 %v623_v31, %v162_v13 }
  0xcf   :  { %v423_v48 = vpop.eup %422  ;;  %v316_v3 = vadd.f32 %v737_v34, %v707_v60  ;;  %372 = vst.msk [vmem:[%s905_s3 + $0x40] sm:$0xf] %vm56_vm1, %v421_v2  ;;  %442 = vtanh.f32 %v251_v36  ;;  %v206_v17 = vadd.f32 %v636_v39, %v198_v29  ;;  %v323_v11 = vmul.f32 %v630_v35, %v161_v5 }
  0xd0   :  { %v425_v15 = vpop.eup %424  ;;  %375 = vst.msk [vmem:[%s905_s3 + $0x58] sm:$0xf] %vm56_vm1, %v423_v48  ;;  %444 = vtanh.f32 %v295_v49  ;;  %v249_v31 = vadd.f32 %v640_v41, %v241_v1  ;;  %v285_v60 = vadd.f32 %v279_v53, %v732_v32  ;;  %v286_v4 = vadd.f32 %v280_v20, %v734_v33 }
  0xd1   :  { %v427_v34 = vpop.eup %426  ;;  %364 = vst.msk [vmem:[%s905_s3] sm:$0xff] %vm53_vm0, %v425_v15  ;;  %446 = vtanh.f32 %v339_v50  ;;  %v250_v39 = vadd.f32 %v640_v41, %v242_v30  ;;  %v324_v24 = vmul.f32 %v630_v35, %v162_v13  ;;  %v329_v27 = vadd.f32 %v323_v11, %v739_v19 }
  0xd2   :  { %v429_v54 = vpop.eup %428  ;;  %365 = vst.msk [vmem:[%s905_s3 + $0x8] sm:$0xff] %vm53_vm0, %v427_v34  ;;  %v293_v32 = vadd.f32 %v643_v42, %v285_v60  ;;  %448 = vtanh.f32 %v205_v63  ;;  %v294_v41 = vadd.f32 %v643_v42, %v286_v4 }
  0xd3   :  { %v431_v33 = vpop.eup %430  ;;  %367 = vst.msk [vmem:[%s905_s3 + $0x18] sm:$0xff] %vm53_vm0, %v429_v54  ;;  %v330_v35 = vadd.f32 %v324_v24, %v316_v3  ;;  %450 = vtanh.f32 %v206_v17  ;;  %v337_v21 = vadd.f32 %v646_v43, %v329_v27 }
  0xd4   :  { %v433_v19 = vpop.eup %432  ;;  %368 = vst.msk [vmem:[%s905_s3 + $0x20] sm:$0xff] %vm53_vm0, %v431_v33  ;;  %452 = vtanh.f32 %v249_v31 }
  0xd5   :  { %v435_v55 = vpop.eup %434  ;;  %370 = vst.msk [vmem:[%s905_s3 + $0x30] sm:$0xff] %vm53_vm0, %v433_v19  ;;  %v338_v56 = vadd.f32 %v646_v43, %v330_v35  ;;  %454 = vtanh.f32 %v250_v39 }
  0xd6   :  { %v437_v42 = vpop.eup %436  ;;  %371 = vst.msk [vmem:[%s905_s3 + $0x38] sm:$0xff] %vm53_vm0, %v435_v55  ;;  %456 = vtanh.f32 %v293_v32 }
  0xd7   :  { %v439_v57 = vpop.eup %438  ;;  %373 = vst.msk [vmem:[%s905_s3 + $0x48] sm:$0xff] %vm53_vm0, %v437_v42  ;;  %458 = vtanh.f32 %v294_v41 }
  0xd8   :  { %v441_v22 = vpop.eup %440  ;;  %374 = vst.msk [vmem:[%s905_s3 + $0x50] sm:$0xff] %vm53_vm0, %v439_v57  ;;  %460 = vtanh.f32 %v337_v21 }
  0xd9   :  { %v443_v43 = vpop.eup %442  ;;  %378 = vst.msk [vmem:[%s905_s3 + $0x70] sm:$0xf] %vm56_vm1, %v441_v22  ;;  %462 = vtanh.f32 %v338_v56 }
  0xda   :  { %v445_v44 = vpop.eup %444  ;;  %381 = vst.msk [vmem:[%s905_s3 + $0x88] sm:$0xf] %vm56_vm1, %v443_v43 }
  0xdb   :  { %v447_v45 = vpop.eup %446  ;;  %384 = vst.msk [vmem:[%s905_s3 + $0xa0] sm:$0xf] %vm56_vm1, %v445_v44 }
  0xdc   :  { %v449_v10 = vpop.eup %448  ;;  %387 = vst.msk [vmem:[%s905_s3 + $0xb8] sm:$0xf] %vm56_vm1, %v447_v45 }
  0xdd   :  { %v451_v12 = vpop.eup %450  ;;  %376 = vst.msk [vmem:[%s905_s3 + $0x60] sm:$0xff] %vm53_vm0, %v449_v10 }
  0xde   :  { %v453_v58 = vpop.eup %452  ;;  %377 = vst.msk [vmem:[%s905_s3 + $0x68] sm:$0xff] %vm53_vm0, %v451_v12 }
  0xdf   :  { %v455_v23 = vpop.eup %454  ;;  %379 = vst.msk [vmem:[%s905_s3 + $0x78] sm:$0xff] %vm53_vm0, %v453_v58 }
  0xe0   :  { %v457_v59 = vpop.eup %456  ;;  %380 = vst.msk [vmem:[%s905_s3 + $0x80] sm:$0xff] %vm53_vm0, %v455_v23 }
  0xe1   :  { %v459_v0 = vpop.eup %458  ;;  %382 = vst.msk [vmem:[%s905_s3 + $0x90] sm:$0xff] %vm53_vm0, %v457_v59 }
  0xe2   :  { %v461_v18 = vpop.eup %460  ;;  %383 = vst.msk [vmem:[%s905_s3 + $0x98] sm:$0xff] %vm53_vm0, %v459_v0 }
  0xe3   :  { %v463_v25 = vpop.eup %462  ;;  %385 = vst.msk [vmem:[%s905_s3 + $0xa8] sm:$0xff] %vm53_vm0, %v461_v18 }
  0xe4   :  { %386 = vst.msk [vmem:[%s905_s3 + $0xb0] sm:$0xff] %vm53_vm0, %v463_v25 }
  0xe5   :  { %392 = vsyncpa [#allocation4], 1 }
  0xe6   :  { %393 = vsyncpa [#allocation5], 1 }
  0xe7   :  { %394 = vsyncpa [#allocation8], 1 }

</bundles_post_ra>
